<compile_context>
chip_gen: v7x
topology: tpu7x:2x2x1
jax: 0.10.0
libtpu: 0.0.40
codegen_flags: <defaults>
</compile_context>

<pallas_src>
import jax
import jax.numpy as jnp
from jax.experimental import pallas as pl
from jax.experimental.pallas import tpu as pltpu


def _round_up(v, m):
    return ((v + m - 1) // m) * m


def qnet_kernel(x_ref, w1_ref, b1_ref, w2_ref, b2_ref, o_ref):
    # In-kernel bf16 cast of the activation tile (free under the MXU/DMA),
    # fc1 on the MXU with f32 accumulation, bias + ReLU in f32.
    x = x_ref[...].astype(w1_ref.dtype)
    h = jnp.dot(x, w1_ref[...], preferred_element_type=jnp.float32)
    h = jnp.maximum(h + b1_ref[...], 0.0)          # b1 is (1, hid) -> broadcast
    # fc2: recast hidden to bf16 for the MXU, accumulate in f32, add bias.
    y = jnp.dot(h.astype(w2_ref.dtype), w2_ref[...],
                preferred_element_type=jnp.float32)
    o_ref[...] = (y + b2_ref[...]).astype(o_ref.dtype)


def prepare_params(w1, b1, w2, b2, *, compute_dtype=jnp.bfloat16):
    """One-time parameter prep (NOT per forward call):
       - cast w1/w2 to bf16,
       - zero-pad fc2 weight/bias to a lane-dense (multiple of 128) output width.
    Weights are stored transposed vs. PyTorch nn.Linear so the kernel computes
    plain x @ w + b (identical math to fc(x))."""
    hid = w1.shape[1]
    out_size = w2.shape[1]
    out_pad = _round_up(max(out_size, 1), 128)

    w1c = w1.astype(compute_dtype)
    b1p = b1.astype(jnp.float32).reshape(1, hid)
    w2c = jnp.zeros((hid, out_pad), compute_dtype).at[:, :out_size].set(
        w2.astype(compute_dtype))
    b2p = jnp.zeros((1, out_pad), jnp.float32).at[0, :out_size].set(
        b2.astype(jnp.float32))
    return w1c, b1p, w2c, b2p, out_size


def qnetwork_forward(x, w1c, b1p, w2c, b2p, out_size, *, tb=None):
    """Fused QNetwork forward: relu(x @ w1 + b1) @ w2 + b2.

    x : (B, in) f32;  w1c: (in, hid) bf16;  b1p: (1, hid) f32;
    w2c: (hid, out_pad) bf16;  b2p: (1, out_pad) f32 (lane-padded).
    Returns (B, out_size) in x.dtype.
    """
    B, in_size = x.shape
    hid = w1c.shape[1]
    out_pad = w2c.shape[1]

    # Batch tile: default to ~B/2 (>=2 grid steps -> both v7x TensorCores),
    # capped at 1024 rows, multiple of 8 (f32 sublanes).
    if tb is None:
        tb = _round_up(-(-B // 2), 8) if B >= 16 else _round_up(B, 8)
        tb = min(tb, 1024)
    else:
        tb = min(_round_up(tb, 8), _round_up(B, 8))
    tb = max(tb, 8)
    n_tiles = pl.cdiv(B, tb)   # ragged last tile handled (masked) by Pallas

    out = pl.pallas_call(
        qnet_kernel,
        out_shape=jax.ShapeDtypeStruct((B, out_pad), x.dtype),
        grid=(n_tiles,),
        in_specs=[
            # batch-tiled activation (f32; cast to bf16 inside the kernel)
            pl.BlockSpec((tb, in_size), lambda i: (i, 0)),
            # weights / biases: constant index_map -> loaded once, VMEM-resident
            pl.BlockSpec((in_size, hid), lambda i: (0, 0)),
            pl.BlockSpec((1, hid), lambda i: (0, 0)),
            pl.BlockSpec((hid, out_pad), lambda i: (0, 0)),
            pl.BlockSpec((1, out_pad), lambda i: (0, 0)),
        ],
        # lane-dense (tb, 128) output tile -> full-width unmasked stores
        out_specs=pl.BlockSpec((tb, out_pad), lambda i: (i, 0)),
        compiler_params=pltpu.CompilerParams(
            dimension_semantics=("parallel",),
        ),
    )(x, w1c, b1p, w2c, b2p)

    return out[:, :out_size]


def init_params(key, input_size, hidden_size, output_size, dtype=jnp.float32):
    """Deterministic init mimicking nn.Linear default: U(-1/sqrt(fan_in), +1/sqrt(fan_in))."""
    k1, k2, k3, k4 = jax.random.split(key, 4)
    bound1 = 1.0 / (input_size ** 0.5)
    bound2 = 1.0 / (hidden_size ** 0.5)
    w1 = jax.random.uniform(k1, (input_size, hidden_size), dtype, -bound1, bound1)
    b1 = jax.random.uniform(k2, (hidden_size,), dtype, -bound1, bound1)
    w2 = jax.random.uniform(k3, (hidden_size, output_size), dtype, -bound2, bound2)
    b2 = jax.random.uniform(k4, (output_size,), dtype, -bound2, bound2)
    return w1, b1, w2, b2


if __name__ == "__main__":
    key = jax.random.PRNGKey(0)
    kx, kp = jax.random.split(key)

    # Lane/MXU-friendly demo sizes: hidden a multiple of 128, batch large enough
    # that the 2-tile grid amortizes launch overhead.
    batch = 256
    input_size = 16    # state dim
    hidden_size = 128
    output_size = 4    # number of actions

    x = jax.random.normal(kx, (batch, input_size), dtype=jnp.float32)
    w1, b1, w2, b2 = init_params(kp, input_size, hidden_size, output_size)

    # One-time param prep (bf16 cast + lane-padding of fc2), then fused forward.
    w1c, b1p, w2c, b2p, out_size = prepare_params(w1, b1, w2, b2)
    out = qnetwork_forward(x, w1c, b1p, w2c, b2p, out_size)
    out = jax.block_until_ready(out)

    # Pure-JAX f32 reference (kernel uses bf16 MXU operands -> loose tolerance).
    ref = jnp.maximum(x @ w1 + b1, 0.0) @ w2 + b2
    assert out.shape == (batch, output_size)
    assert jnp.allclose(out, ref, atol=2e-2, rtol=2e-2)

    print("KERNEL_OK")
</pallas_src>

<mosaic_0001>
module attributes {stable_mosaic.version = 11 : i64} {
  func.func @qnet_kernel(%arg0: i32, %arg1: memref<128x16xf32, #tpu.memory_space<vmem>>, %arg2: memref<16x128xbf16, #tpu.memory_space<vmem>>, %arg3: memref<1x128xf32, #tpu.memory_space<vmem>>, %arg4: memref<128x128xbf16, #tpu.memory_space<vmem>>, %arg5: memref<1x128xf32, #tpu.memory_space<vmem>>, %arg6: memref<128x128xf32, #tpu.memory_space<vmem>>) attributes {dimension_semantics = [#tpu.dimension_semantics<parallel>], iteration_bounds = array<i64: 2>, scalar_prefetch = 0 : i64, scratch_operands = 0 : i64, tpu.core_type = #tpu.core_type<tc>, window_params = [{transform_indices = @transform_0, window_bounds = array<i64: 128, 16>}, {pipeline_mode = #tpu.pipeline_mode<synchronous>, transform_indices = @transform_1, window_bounds = array<i64: 16, 128>}, {pipeline_mode = #tpu.pipeline_mode<synchronous>, transform_indices = @transform_2, window_bounds = array<i64: 1, 128>}, {pipeline_mode = #tpu.pipeline_mode<synchronous>, transform_indices = @transform_3, window_bounds = array<i64: 128, 128>}, {pipeline_mode = #tpu.pipeline_mode<synchronous>, transform_indices = @transform_4, window_bounds = array<i64: 1, 128>}, {transform_indices = @transform_5, window_bounds = array<i64: 128, 128>}]} {
    %c0 = arith.constant 0 : index
    %c0_0 = arith.constant 0 : index
    %0 = vector.load %arg1[%c0, %c0_0] : memref<128x16xf32, #tpu.memory_space<vmem>>, vector<128x16xf32>
    %1 = arith.truncf %0 : vector<128x16xf32> to vector<128x16xbf16>
    %c0_1 = arith.constant 0 : index
    %c0_2 = arith.constant 0 : index
    %2 = vector.load %arg2[%c0_1, %c0_2] : memref<16x128xbf16, #tpu.memory_space<vmem>>, vector<16x128xbf16>
    %cst = arith.constant dense<0.000000e+00> : vector<128x128xf32>
    %3 = tpu.matmul %1, %2, %cst {dimension_numbers = #tpu.dot_dimension_numbers<[1], [0], [0], [1], [0, 0, 1, 1], [], []>} : vector<128x16xbf16>, vector<16x128xbf16>, vector<128x128xf32> -> vector<128x128xf32>
    %c0_3 = arith.constant 0 : index
    %c0_4 = arith.constant 0 : index
    %4 = vector.load %arg3[%c0_3, %c0_4] : memref<1x128xf32, #tpu.memory_space<vmem>>, vector<1x128xf32>
    %5 = vector.broadcast %4 : vector<1x128xf32> to vector<128x128xf32>
    %6 = arith.addf %3, %5 : vector<128x128xf32>
    %cst_5 = arith.constant 0.000000e+00 : f32
    %7 = vector.broadcast %cst_5 : f32 to vector<128x128xf32>
    %8 = arith.maximumf %6, %7 : vector<128x128xf32>
    %9 = arith.truncf %8 : vector<128x128xf32> to vector<128x128xbf16>
    %c0_6 = arith.constant 0 : index
    %c0_7 = arith.constant 0 : index
    %10 = vector.load %arg4[%c0_6, %c0_7] : memref<128x128xbf16, #tpu.memory_space<vmem>>, vector<128x128xbf16>
    %cst_8 = arith.constant dense<0.000000e+00> : vector<128x128xf32>
    %11 = tpu.matmul %9, %10, %cst_8 {dimension_numbers = #tpu.dot_dimension_numbers<[1], [0], [0], [1], [0, 0, 1, 1], [], []>} : vector<128x128xbf16>, vector<128x128xbf16>, vector<128x128xf32> -> vector<128x128xf32>
    %c0_9 = arith.constant 0 : index
    %c0_10 = arith.constant 0 : index
    %12 = vector.load %arg5[%c0_9, %c0_10] : memref<1x128xf32, #tpu.memory_space<vmem>>, vector<1x128xf32>
    %13 = vector.broadcast %12 : vector<1x128xf32> to vector<128x128xf32>
    %14 = arith.addf %11, %13 : vector<128x128xf32>
    %c0_11 = arith.constant 0 : index
    %c0_12 = arith.constant 0 : index
    %15 = vector.load %arg6[%c0_11, %c0_12] : memref<128x128xf32, #tpu.memory_space<vmem>>, vector<128x128xf32>
    tpu.vector_store %arg6[%c0_11, %c0_12], %14 {strides = array<i32>} : memref<128x128xf32, #tpu.memory_space<vmem>>, vector<128x128xf32>,
    return
  }
  func.func @transform_0(%arg0: i32) -> (i32, i32) {
    %c0_i32 = arith.constant 0 : i32
    %c0_i32_0 = arith.constant 0 : i32
    return %arg0, %c0_i32 : i32, i32
  }
  func.func @transform_1(%arg0: i32) -> (i32, i32) {
    %c0_i32 = arith.constant 0 : i32
    %c0_i32_0 = arith.constant 0 : i32
    %c0_i32_1 = arith.constant 0 : i32
    return %c0_i32, %c0_i32_0 : i32, i32
  }
  func.func @transform_2(%arg0: i32) -> (i32, i32) {
    %c0_i32 = arith.constant 0 : i32
    %c0_i32_0 = arith.constant 0 : i32
    %c0_i32_1 = arith.constant 0 : i32
    return %c0_i32, %c0_i32_0 : i32, i32
  }
  func.func @transform_3(%arg0: i32) -> (i32, i32) {
    %c0_i32 = arith.constant 0 : i32
    %c0_i32_0 = arith.constant 0 : i32
    %c0_i32_1 = arith.constant 0 : i32
    return %c0_i32, %c0_i32_0 : i32, i32
  }
  func.func @transform_4(%arg0: i32) -> (i32, i32) {
    %c0_i32 = arith.constant 0 : i32
    %c0_i32_0 = arith.constant 0 : i32
    %c0_i32_1 = arith.constant 0 : i32
    return %c0_i32, %c0_i32_0 : i32, i32
  }
  func.func @transform_5(%arg0: i32) -> (i32, i32) {
    %c0_i32 = arith.constant 0 : i32
    %c0_i32_0 = arith.constant 0 : i32
    return %arg0, %c0_i32 : i32, i32
  }
}

</mosaic_0001>

<bundles_post_ra>
// kernel: tpu_custom_call.1
= control target key start
LH: loop header
LB: loop body
LE: loop exit
PB: predicated region body
PF: predicated region fallthrough
CT: control target
= control target key end

     0   :  { %10 = vsyncpa [#allocation3], 0  ;;  %s1126_s0 = inlined_call_operand.vmem [shape: f32[256,16], index: 0, kind: input, shape index: {}]   ;;  %s1127_s1 = inlined_call_operand.vmem [shape: bf16[16,128], index: 1, kind: input, shape index: {}]   ;;  %s1128_s2 = inlined_call_operand.vmem [shape: f32[1,128], index: 2, kind: input, shape index: {}]   ;;  %s1129_s3 = inlined_call_operand.vmem [shape: bf16[128,128], index: 3, kind: input, shape index: {}]   ;;  %s1130_s4 = inlined_call_operand.vmem [shape: f32[1,128], index: 4, kind: input, shape index: {}]   ;;  %s1131_s5 = inlined_call_operand.hbm [shape: f32[256,128], index: 5, kind: output, shape index: {}]  }
   0x1   :  { %12 = vsyncpa [#allocation3 + $0x1], 0  ;;  %s942_s18 = smov 0   ;;  %s944_s19 = smov 0  }
   0x2   :  { %s946_s20 = smov 0   ;;  %s948_s21 = smov 0  }
   0x3 LB: > { %s963_s22 = sadd.s32 4294967295, %s907_s21   ;;  %s672_s23 = sadd.s32 4294967294, %s907_s21   ;;  %s907_s21 = sphi %s948_s21, %s1137_s21   ;;  %s903_s20 = sphi %s946_s20, %s1136_s20   ;;  %s899_s19 = sphi %s944_s19, %s1135_s19   ;;  %s895_s18 = sphi %s942_s18, %s1134_s18  }
   0x4   : > { %s967_s24 = sadd.s32 1, %s907_s21   ;;  %s135_s25 = sadd.s32 1, %s903_s20 }
   0x5   : > { %s132_s26 = ssub.s32 %s907_s21, %s967_s24  ;;  %p145_p0 = scmp.ne.s32.totalorder %s903_s20, %s899_s19 }
   0x6   : > { %p133_p1 = scmp.eq.s32.totalorder %s132_s26, 0  ;;  %p146_p2 = scmp.eq.s32.totalorder %s963_s22, 1 }
   0x7   : > { %p151_p3 = scmp.ne.s32.totalorder %s899_s19, %s895_s18  ;;  %p152_p4 = scmp.eq.s32.totalorder %s672_s23, 1 }
   0x8   : > { %s978_s27 = scalar_select %p133_p1, %s903_s20, %s135_s25  }
   0x9   : > { %p980_p5 = por %p146_p2, %p145_p0  ;;  %p984_p6 = por %p152_p4, %p151_p3 }
   0xa   : > { %p675_p7 = scmp.ge.s32.totalorder %s907_s21, 1  ;;  %p191_p8 = scmp.lt.s32.totalorder %s907_s21, 3 }
   0xc   : > { %p192_p9 = pnand %p675_p7, %p191_p8 }
   0xd   : > { %v836_v0 = vld [vmem:[%s1127_s1] sm:$0xff] (!%p192_p9)   ;;  %s677_s7 = sshll.u32 (!%p192_p9), %s963_s22, 4  ;;  %v838_v2 = vld [vmem:[%s1129_s3 + $0x8] sm:$0xff] (!%p192_p9)   ;;  %v839_v3 = vld [vmem:[%s1129_s3 + $0x10] sm:$0xff] (!%p192_p9)   ;;  %vm266_vm0 = vcmask (!%p192_p9), 130048   ;;  %s216_s14 = sand.u32 (!%p192_p9), 1, %s899_s19  }
   0xe   : > { %195 = sbr.rel (%p192_p9) target bundleno = 506 (0x1fa), region = 40  ;;  %p220_p10 = scmp.lt.s32.totalorder (!%p192_p9), %s677_s7, 31  ;;  %729 = vmatprep.subr.bf16.mxu0 (!%p192_p9), %v836_v0  ;;  %v837_v1 = vld [vmem:[%s1129_s3] sm:$0xff] (!%p192_p9)   ;;  %v840_v15 = vld [vmem:[%s1129_s3 + $0x18] sm:$0xff] (!%p192_p9)   ;;  %v842_v23 = vld [vmem:[%s1129_s3 + $0x28] sm:$0xff] (!%p192_p9)  }
   0xf   : > { %730 = vmatpush3.bf16.msra.mxu0 (!%p192_p9), %v836_v0  ;;  %779 = vmatprep.subr.bf16.mxu1 (!%p192_p9), %v837_v1  ;;  %v841_v20 = vld [vmem:[%s1129_s3 + $0x20] sm:$0xff] (!%p192_p9)   ;;  %v843_v31 = vld [vmem:[%s1129_s3 + $0x30] sm:$0xff] (!%p192_p9)   ;;  %v844_v32 = vld [vmem:[%s1129_s3 + $0x38] sm:$0xff] (!%p192_p9)   ;;  %s703_s25 = sshll.u32 (!%p192_p9), %s963_s22, 11  ;;  %s1085_s22 = scalar_lea.sflag (!%p192_p9), [#allocation3], %s216_s14 }
  0x10   : > { %747 = vmatprep.subr.bf16.mxu0 (!%p192_p9), %v837_v1  ;;  %787 = vmatpush3.bf16.msra.mxu1 (!%p192_p9), %v837_v1  ;;  %v679_v33 = vld [vmem:[%s1128_s2] ss:$0 sm:$0xff] (!%p192_p9)  ;;  %s909_s9 = smov (!%p192_p9), [#allocation2]  }
  0x11   : > { %780 = vmatprep.subr.bf16.mxu1 (!%p192_p9), %v838_v2  ;;  %s849_s10 = sshll.u32 (!%p192_p9), %s909_s9, 4  ;;  %s850_s10 = int_to_ptr.vmem [resolvable:$false] %s849_s10 }
  0x12   : > { %s851_s11 = scalar_lea.vmem (!%p192_p9), %s850_s10, 4096 }
  0x14   : > { %788 = vmatpush3.bf16.msra.mxu1 (!%p192_p9), %v838_v2 }
  0x15   : > { %s1139_s7 = smov (!%p220_p10, %s677_s7), 31  ;;  %781 = vmatprep.subr.bf16.mxu1 %v839_v3 }
  0x16   : > { %s678_s12 = sshll.u32 %s1139_s7, 3  ;;  %s1076_s7 = scalar_lea.hbm %s1131_s5, %s703_s25 }
  0x17   : > { %s1003_s15 = scalar_lea.vmem %s1126_s0, %s678_s12 }
  0x18   : > { %v227_v4 = vld [vmem:[%s1003_s15] sm:$0xff]  ;;  %v228_v5 = vld [vmem:[%s1003_s15 + $0x8] sm:$0xff]  ;;  %v229_v6 = vld [vmem:[%s1003_s15 + $0x10] sm:$0xff]  ;;  %789 = vmatpush3.bf16.msra.mxu1 %v839_v3 }
  0x19   : > { %v243_v7 = vpack.c.bf16 %v228_v5, %v227_v4  ;;  %v230_v8 = vld [vmem:[%s1003_s15 + $0x18] sm:$0xff]  ;;  %v231_v9 = vld [vmem:[%s1003_s15 + $0x20] sm:$0xff]  ;;  %v232_v10 = vld [vmem:[%s1003_s15 + $0x28] sm:$0xff]  ;;  %782 = vmatprep.subr.bf16.mxu1 %v840_v15 }
  0x1a   : > { %v244_v11 = vpack.c.bf16 %v230_v8, %v229_v6  ;;  %v245_v12 = vpack.c.bf16 %v232_v10, %v231_v9  ;;  %v233_v13 = vld [vmem:[%s1003_s15 + $0x30] sm:$0xff]  ;;  %v234_v14 = vld [vmem:[%s1003_s15 + $0x38] sm:$0xff]  ;;  %v235_v16 = vld [vmem:[%s1003_s15 + $0x40] sm:$0xff] }
  0x1b   : > { %731 = vmatprep.mubr.msk.bf16.mxu0 %vm266_vm0, %v243_v7  ;;  %v236_v17 = vld [vmem:[%s1003_s15 + $0x48] sm:$0xff]  ;;  %v246_v18 = vpack.c.bf16 %v234_v14, %v233_v13  ;;  %v237_v21 = vld [vmem:[%s1003_s15 + $0x50] sm:$0xff]  ;;  %v238_v22 = vld [vmem:[%s1003_s15 + $0x58] sm:$0xff] }
  0x1c   : > { %732 = vmatmul.mubr.msk.bf16.vlgmr.msra.gmra.mrb[0].mxu0 %vm266_vm0, %v244_v11  ;;  %v247_v19 = vpack.c.bf16 %v236_v17, %v235_v16  ;;  %790 = vmatpush3.bf16.msra.mxu1 %v840_v15  ;;  %v239_v24 = vld [vmem:[%s1003_s15 + $0x60] sm:$0xff]  ;;  %v240_v25 = vld [vmem:[%s1003_s15 + $0x68] sm:$0xff]  ;;  %v248_v26 = vpack.c.bf16 %v238_v22, %v237_v21  ;;  %v241_v28 = vld [vmem:[%s1003_s15 + $0x70] sm:$0xff] }
  0x1d   : > { %735 = vmatprep.mubr.msk.bf16.mxu0 %vm266_vm0, %v245_v12  ;;  %748 = vmatpush3.bf16.msra.mxu0 %v837_v1  ;;  %v249_v27 = vpack.c.bf16 %v240_v25, %v239_v24  ;;  %v242_v29 = vld [vmem:[%s1003_s15 + $0x78] sm:$0xff]  ;;  %s676_s15 = sshll.u32 %s216_s14, 7 }
  0x1e   : > { %749 = vmatprep.subr.bf16.mxu0 %v838_v2  ;;  %783 = vmatprep.subr.bf16.mxu1 %v841_v20  ;;  %v250_v30 = vpack.c.bf16 %v242_v29, %v241_v28  ;;  %s1056_s23 = scalar_lea.vmem [#allocation2], %s676_s15 }
  0x1f   : > { %s610_s26 = sshll.u32 %s1056_s23, 4  ;;  %s1078_s26 = int_to_ptr.vmem [resolvable:$true] %s610_s26 }
  0x20   : > { %791 = vmatpush3.bf16.msra.mxu1 %v841_v20  ;;  %s845_s8 = scalar_lea.vmem %s1078_s26, 2048  ;;  %p852_p0 = scmp.lt.s32.totalorder %s1078_s26, %s850_s10 }
  0x21   : > { %750 = vmatpush3.bf16.msra.mxu0 %v838_v2  ;;  %784 = vmatprep.subr.bf16.mxu1 %v842_v23  ;;  %p846_p11 = scmp.ne.s32.totalorder %s1078_s26, %s845_s8  ;;  %p853_p1 = scmp.lt.s32.totalorder %s851_s11, %s845_s8 }
  0x22   : > { %751 = vmatprep.subr.bf16.mxu0 %v839_v3 }
  0x23   : > { %p847_p12 = pnand %p846_p11, %p980_p5  ;;  %p854_p2 = por %p853_p1, %p852_p0 }
  0x24   : > { %736 = vmatmul.mubr.msk.bf16.gmra.mrb[4].mxu0 %vm266_vm0, %v246_v18  ;;  %792 = vmatpush3.bf16.msra.mxu1 %v842_v23 }
  0x25   : > { %739 = vmatprep.mubr.msk.bf16.mxu0 %vm266_vm0, %v247_v19  ;;  %752 = vmatpush3.bf16.msra.mxu0 %v839_v3  ;;  %p848_p13 = pneg %p847_p12 }
  0x26   : > { %753 = vmatprep.subr.bf16.mxu0 %v840_v15  ;;  %785 = vmatprep.subr.bf16.mxu1 %v843_v31 }
  0x27   : > { %p855_p3 = pnand %p854_p2, %p848_p13 }
  0x28   : > { %793 = vmatpush3.bf16.msra.mxu1 %v843_v31 }
  0x29   : > { %754 = vmatpush3.bf16.msra.mxu0 %v840_v15  ;;  %786 = vmatprep.subr.bf16.mxu1 %v844_v32 }
  0x2a   : > { %755 = vmatprep.subr.bf16.mxu0 %v841_v20 }
  0x2c   : > { %740 = vmatmul.mubr.msk.bf16.gmra.mrb[8].mxu0 %vm266_vm0, %v248_v26  ;;  %794 = vmatpush3.bf16.msra.mxu1 %v844_v32  ;;  %v689_v26 = vld [vmem:[%s1130_s4] ss:$0 sm:$0xff] }
  0x2d   : > { %743 = vmatprep.mubr.msk.bf16.mxu0 %vm266_vm0, %v249_v27  ;;  %756 = vmatpush3.bf16.msra.mxu0 %v841_v20 }
  0x2e   : > { %757 = vmatprep.subr.bf16.mxu0 %v842_v23 }
  0x31   : > { %758 = vmatpush3.bf16.msra.mxu0 %v842_v23 }
  0x32   : > { %759 = vmatprep.subr.bf16.mxu0 %v843_v31 }
  0x34   : > { %744 = vmatmul.mubr.msk.bf16.gmra.mrb[12].mxu0 %vm266_vm0, %v250_v30 }
  0x35   : > { %760 = vmatpush3.bf16.msra.mxu0 %v843_v31 }
  0x36   : > { %761 = vmatprep.subr.bf16.mxu0 %v844_v32 }
  0x39   : > { %762 = vmatpush3.bf16.msra.mxu0 %v844_v32 }
  0xef   : > { %v733_v34 = vpop.f32.mrb[0].mxu0 }
  0xf0   : > { %v334_v35 = vadd.f32 %v733_v34, %v679_v33  ;;  %v325_v36 = vpop.f32.mrb[1].mxu0 }
  0xf1   : > { %v326_v37 = vadd.f32 %v679_v33, %v325_v36  ;;  %v734_v38 = vpop.f32.mrb[2].mxu0 }
  0xf2   : > { %v337_v39 = vadd.f32 %v734_v38, %v679_v33  ;;  %v328_v40 = vpop.f32.mrb[3].mxu0  ;;  %v390_v42 = vmax.f32 %v334_v35, 0.0 }
  0xf3   : > { %v329_v41 = vadd.f32 %v679_v33, %v328_v40  ;;  %v388_v44 = vmax.f32 %v326_v37, 0.0 }
  0xf4   : > { %v391_v43 = vmax.f32 %v337_v39, 0.0 }
  0xf5   : > { %v389_v45 = vmax.f32 %v329_v41, 0.0 }
  0xf6   : > { %v405_v46 = vpack.c.bf16 %v391_v43, %v390_v42 }
  0xf7   : > { %v404_v47 = vpack.c.bf16 %v389_v45, %v388_v44  ;;  %v737_v48 = vpop.f32.mrb[4].mxu0 }
  0xf8   : > { %v350_v49 = vadd.f32 %v737_v48, %v679_v33  ;;  %v341_v50 = vpop.f32.mrb[5].mxu0 }
  0xf9   : > { %v342_v51 = vadd.f32 %v679_v33, %v341_v50  ;;  %v738_v52 = vpop.f32.mrb[6].mxu0  ;;  %763 = vmatprep.mubr.bf16.mxu0 %v404_v47 }
  0xfa   : > { %v353_v53 = vadd.f32 %v738_v52, %v679_v33  ;;  %v344_v54 = vpop.f32.mrb[7].mxu0  ;;  %764 = vmatmul.mubr.bf16.vlgmr.msra.gmra.mrb[16].mxu0 %v405_v46  ;;  %v394_v56 = vmax.f32 %v350_v49, 0.0 }
  0xfb   : > { %v345_v55 = vadd.f32 %v679_v33, %v344_v54  ;;  %v392_v58 = vmax.f32 %v342_v51, 0.0 }
  0xfc   : > { %v395_v57 = vmax.f32 %v353_v53, 0.0 }
  0xfd   : > { %v393_v59 = vmax.f32 %v345_v55, 0.0 }
  0xfe   : > { %v407_v60 = vpack.c.bf16 %v395_v57, %v394_v56 }
  0xff   : > { %v741_v61 = vpop.f32.mrb[8].mxu0  ;;  %v406_v62 = vpack.c.bf16 %v393_v59, %v392_v58 }
 0x100   : > { %v366_v63 = vadd.f32 %v741_v61, %v679_v33  ;;  %v357_v0 = vpop.f32.mrb[9].mxu0 }
 0x101   : > { %v358_v1 = vadd.f32 %v679_v33, %v357_v0  ;;  %v742_v2 = vpop.f32.mrb[10].mxu0  ;;  %767 = vmatprep.mubr.bf16.mxu1 %v406_v62 }
 0x102   : > { %v369_v3 = vadd.f32 %v742_v2, %v679_v33  ;;  %v360_v4 = vpop.f32.mrb[11].mxu0  ;;  %768 = vmatmul.mubr.bf16.vlgmr.msra.gmra.mrb[0].mxu1 %v407_v60  ;;  %v398_v6 = vmax.f32 %v366_v63, 0.0 }
 0x103   : > { %v361_v5 = vadd.f32 %v679_v33, %v360_v4  ;;  %v396_v8 = vmax.f32 %v358_v1, 0.0 }
 0x104   : > { %v399_v7 = vmax.f32 %v369_v3, 0.0 }
 0x105   : > { %v397_v9 = vmax.f32 %v361_v5, 0.0 }
 0x106   : > { %v409_v10 = vpack.c.bf16 %v399_v7, %v398_v6 }
 0x107   : > { %v408_v11 = vpack.c.bf16 %v397_v9, %v396_v8  ;;  %v745_v12 = vpop.f32.mrb[12].mxu0 }
 0x108   : > { %v382_v13 = vadd.f32 %v745_v12, %v679_v33  ;;  %v373_v14 = vpop.f32.mrb[13].mxu0 }
 0x109   : > { %v374_v15 = vadd.f32 %v679_v33, %v373_v14  ;;  %v746_v16 = vpop.f32.mrb[14].mxu0  ;;  %771 = vmatprep.mubr.bf16.mxu1 %v408_v11 }
 0x10a   : > { %v385_v17 = vadd.f32 %v746_v16, %v679_v33  ;;  %v376_v18 = vpop.f32.mrb[15].mxu0  ;;  %772 = vmatmul.mubr.bf16.gmra.mrb[4].mxu1 %v409_v10  ;;  %v402_v20 = vmax.f32 %v382_v13, 0.0 }
 0x10b   : > { %v377_v19 = vadd.f32 %v679_v33, %v376_v18  ;;  %v400_v22 = vmax.f32 %v374_v15, 0.0 }
 0x10c   : > { %v403_v21 = vmax.f32 %v385_v17, 0.0 }
 0x10d   : > { %v401_v23 = vmax.f32 %v377_v19, 0.0 }
 0x10e   : > { %v411_v24 = vpack.c.bf16 %v403_v21, %v402_v20 }
 0x10f   : > { %v410_v25 = vpack.c.bf16 %v401_v23, %v400_v22 }
 0x111   : > { %775 = vmatprep.mubr.bf16.mxu1 %v410_v25 }
 0x112   : > { %776 = vmatmul.mubr.bf16.gmra.mrb[8].mxu1 %v411_v24 }
 0x1cd   : > { %v765_v27 = vpop.f32.mrb[16].mxu0 }
 0x1ce   : > { %v526_v28 = vadd.f32 %v765_v27, %v689_v26  ;;  %v517_v29 = vpop.f32.mrb[17].mxu0 }
 0x1cf   : > { %v518_v30 = vadd.f32 %v689_v26, %v517_v29  ;;  %v766_v31 = vpop.f32.mrb[18].mxu0 }
 0x1d0   : > { %582 = vst [vmem:[%s1056_s23 + $0x10] sm:$0xff] %v526_v28  ;;  %v529_v32 = vadd.f32 %v766_v31, %v689_v26  ;;  %v520_v33 = vpop.f32.mrb[19].mxu0 }
 0x1d1   : > { %580 = vst [vmem:[%s1056_s23] sm:$0xff] %v518_v30  ;;  %v521_v34 = vadd.f32 %v689_v26, %v520_v33 }
 0x1d2   : > { %583 = vst [vmem:[%s1056_s23 + $0x18] sm:$0xff] %v529_v32 }
 0x1d3   : > { %581 = vst [vmem:[%s1056_s23 + $0x8] sm:$0xff] %v521_v34 }
 0x1d5   : > { %v769_v35 = vpop.f32.mrb[0].mxu1 }
 0x1d6   : > { %v542_v36 = vadd.f32 %v769_v35, %v689_v26  ;;  %v533_v37 = vpop.f32.mrb[1].mxu1 }
 0x1d7   : > { %v534_v38 = vadd.f32 %v689_v26, %v533_v37  ;;  %v770_v39 = vpop.f32.mrb[2].mxu1 }
 0x1d8   : > { %586 = vst [vmem:[%s1056_s23 + $0x30] sm:$0xff] %v542_v36  ;;  %v545_v40 = vadd.f32 %v770_v39, %v689_v26  ;;  %v536_v41 = vpop.f32.mrb[3].mxu1 }
 0x1d9   : > { %584 = vst [vmem:[%s1056_s23 + $0x20] sm:$0xff] %v534_v38  ;;  %v537_v42 = vadd.f32 %v689_v26, %v536_v41 }
 0x1da   : > { %587 = vst [vmem:[%s1056_s23 + $0x38] sm:$0xff] %v545_v40 }
 0x1db   : > { %585 = vst [vmem:[%s1056_s23 + $0x28] sm:$0xff] %v537_v42 }
 0x1dd   : > { %v773_v43 = vpop.f32.mrb[4].mxu1 }
 0x1de   : > { %v558_v44 = vadd.f32 %v773_v43, %v689_v26  ;;  %v549_v45 = vpop.f32.mrb[5].mxu1 }
 0x1df   : > { %v550_v46 = vadd.f32 %v689_v26, %v549_v45  ;;  %v774_v47 = vpop.f32.mrb[6].mxu1 }
 0x1e0   : > { %590 = vst [vmem:[%s1056_s23 + $0x50] sm:$0xff] %v558_v44  ;;  %v561_v48 = vadd.f32 %v774_v47, %v689_v26  ;;  %v552_v49 = vpop.f32.mrb[7].mxu1 }
 0x1e1   : > { %588 = vst [vmem:[%s1056_s23 + $0x40] sm:$0xff] %v550_v46  ;;  %v553_v50 = vadd.f32 %v689_v26, %v552_v49 }
 0x1e2   : > { %591 = vst [vmem:[%s1056_s23 + $0x58] sm:$0xff] %v561_v48 }
 0x1e3   : > { %589 = vst [vmem:[%s1056_s23 + $0x48] sm:$0xff] %v553_v50 }
 0x1e5   : > { %v777_v51 = vpop.f32.mrb[8].mxu1 }
 0x1e6   : > { %v574_v52 = vadd.f32 %v777_v51, %v689_v26  ;;  %v565_v53 = vpop.f32.mrb[9].mxu1 }
 0x1e7   : > { %v566_v54 = vadd.f32 %v689_v26, %v565_v53  ;;  %v778_v55 = vpop.f32.mrb[10].mxu1 }
 0x1e8   : > { %594 = vst [vmem:[%s1056_s23 + $0x70] sm:$0xff] %v574_v52  ;;  %v577_v56 = vadd.f32 %v778_v55, %v689_v26  ;;  %v568_v57 = vpop.f32.mrb[11].mxu1 }
 0x1e9   : > { %592 = vst [vmem:[%s1056_s23 + $0x60] sm:$0xff] %v566_v54  ;;  %v569_v58 = vadd.f32 %v689_v26, %v568_v57 }
 0x1ea   : > { %595 = vst [vmem:[%s1056_s23 + $0x78] sm:$0xff] %v577_v56 }
 0x1eb   : > { %593 = vst [vmem:[%s1056_s23 + $0x68] sm:$0xff] %v569_v58 }
 0x1ec   : > { %858 = shalt.err (!%p855_p3)
}
 0x1ed   : > { %s859_s12 = scalar_lea.hbm %s1076_s7, 2048  ;;  %s863_s15 = scalar_lea.hbm %s1131_s5, 4096 }
 0x1ee   : > { %p860_p4 = scmp.ne.s32.totalorder %s1076_s7, %s859_s12  ;;  %p864_p9 = scmp.lt.u32.totalorder %s1076_s7, %s1131_s5 }
 0x1ef   : > { %p865_p10 = scmp.lt.u32.totalorder %s863_s15, %s859_s12  ;;  %p867_p12 = scmp.lt.u32.totalorder %s859_s12, %s1076_s7 }
 0x1f0   : > { %p861_p7 = pnand %p860_p4, %p980_p5 }
 0x1f1   : > { %p866_p11 = por %p865_p10, %p864_p9 }
 0x1f2   : > { %p862_p8 = pneg %p861_p7 }
 0x1f3   : > { %p868_p13 = por %p867_p12, %p866_p11 }
 0x1f5   : > { %p869_p0 = pnand %p868_p13, %p862_p8 }
 0x1f7   : > { %872 = shalt.err (!%p869_p0)
}
 0x1f8   : > { %s910_s23 = smov 128   ;;  %s911_s25 = smov 8  }
 0x1f9   : > { %795 = dma.vmem_to_hbm [thread:$0]  (%p980_p5), %s1078_s26, 2048, %s1076_s7, %s1085_s22, %s910_s23, %s910_s23, %s911_s25  }
 0x1fa PF: > { %p801_p1 = scmp.ge.s32.totalorder %s907_s21, 2  ;;  %s625_s30 = sand.u32 1, %s895_s18  }
 0x1fb   : > { %s626_s6 = scalar_lea.sflag [#allocation3], %s625_s30 }
 0x1fc   : > { %p798_p2 = pnand %p801_p1, %p984_p6 }
 0x1fe   : > { %890 = dma.done.wait (!%p798_p2), %s626_s6, 2048  }
 0x1ff   : > { %892 = vsyncadd (!%p798_p2), %s626_s6, 4294965248  ;;  %p15_p3 = scmp.ge.s32.totalorder %s967_s24, 4   ;;  %s1134_s18 = smov %s899_s19 }
 0x200   : > { %s1135_s19 = smov %s903_s20  ;;  %s1136_s20 = smov %s978_s27 }
 0x201   : > { %s1137_s21 = smov %s967_s24  ;;  %17 = sbr.rel (!%p15_p3) target bundleno = 3 (0x3), region = 75 }
 0x208   :  { %631 = vsyncpa [#allocation3], 1 }
 0x209   :  { %633 = vsyncpa [#allocation3 + $0x1], 1 }

</bundles_post_ra>
